<compile_context>
chip_gen: v7x
topology: tpu7x:2x2x1
jax: 0.10.0
libtpu: 0.0.40
codegen_flags: <defaults>
</compile_context>

<pallas_src>
import functools

import jax
import jax.numpy as jnp
from jax.experimental import pallas as pl
from jax.experimental.pallas import tpu as pltpu


def _round_up(n, m):
    return (n + m - 1) // m * m


def mlp_kernel(x_ref, w1_ref, b1_ref, w2_ref, b2_ref, o_ref):
    # x tile arrives as raw f32 from HBM; cast to bf16 just before the MXU
    # (VPU work, hidden under the MXU slot).
    x_bf16 = x_ref[...].astype(jnp.bfloat16)
    # Layer 1: [tile_b, in_dim] bf16 @ [in_dim, hid] bf16 -> f32 accumulator.
    h = jnp.dot(x_bf16, w1_ref[...], preferred_element_type=jnp.float32)
    h = jnp.maximum(h + b1_ref[...], 0.0)                 # bias + ReLU in f32
    # Layer 2: cast activations to bf16 for the MXU, accumulate in f32.
    out = jnp.dot(h.astype(w2_ref.dtype), w2_ref[...],
                  preferred_element_type=jnp.float32)
    o_ref[...] = (out + b2_ref[...]).astype(o_ref.dtype)  # lane-dense 128-wide store


def prepare_params(w1, b1, w2, b2):
    """One-time layout prep: transpose, pad output dim to 128 lanes, cast to bf16.

    w1: [hid, in] (PyTorch layout), b1: [hid], w2: [out, hid], b2: [out].
    """
    hid, in_dim = w1.shape
    out_dim = w2.shape[0]
    out_pad = _round_up(out_dim, 128)                      # 10 -> 128

    w1_t = w1.T.astype(jnp.bfloat16)                       # [in_dim, hid], no K pad
    w2_t = jnp.zeros((hid, out_pad), jnp.bfloat16)
    w2_t = w2_t.at[:, :out_dim].set(w2.T.astype(jnp.bfloat16))
    b1_2d = b1.reshape(1, hid).astype(jnp.float32)
    b2_2d = jnp.zeros((1, out_pad), jnp.float32).at[:, :out_dim].set(b2)
    return w1_t, b1_2d, w2_t, b2_2d, out_dim


def _choose_tile_b(B):
    """Balanced batch tiles: multiple of 16 (bf16 sublane packing), <= 512 rows,
    and >= 2 grid steps when the batch is big enough (2 TensorCores on v7x)."""
    n_tiles = max(1, pl.cdiv(B, 512))
    if B >= 32:
        n_tiles = max(n_tiles, 2)
    return _round_up(pl.cdiv(B, n_tiles), 16)


@functools.partial(jax.jit, static_argnames=("out_dim",))
def neural_net_forward(x, w1_t, b1_2d, w2_t, b2_2d, out_dim):
    """x: [B, in_dim] f32. Params already prepped by prepare_params."""
    B, in_dim = x.shape
    hid = w1_t.shape[1]
    out_pad = w2_t.shape[1]

    tile_b = _choose_tile_b(B)
    B_pad = _round_up(B, tile_b)
    if B_pad != B:
        # Pad only the batch dim (no dtype change); extra rows are sliced off below.
        x = jnp.pad(x, ((0, B_pad - B), (0, 0)))

    grid = (B_pad // tile_b,)
    flops = 2 * B_pad * (in_dim * hid + hid * out_pad)
    bytes_accessed = (B_pad * in_dim * 4 + w1_t.size * 2 + w2_t.size * 2
                      + (hid + out_pad) * 4 + B_pad * out_pad * 4)

    out = pl.pallas_call(
        mlp_kernel,
        out_shape=jax.ShapeDtypeStruct((B_pad, out_pad), jnp.float32),
        grid_spec=pltpu.PrefetchScalarGridSpec(
            num_scalar_prefetch=0,
            grid=grid,
            in_specs=[
                # x tile: f32, full 784-wide last dim (== full array dim), streamed.
                pl.BlockSpec((tile_b, in_dim), lambda i: (i, 0)),
                pl.BlockSpec((in_dim, hid), lambda i: (0, 0)),      # w1 (VMEM-resident)
                pl.BlockSpec((1, hid), lambda i: (0, 0)),           # b1 (resident)
                pl.BlockSpec((hid, out_pad), lambda i: (0, 0)),     # w2 (resident)
                pl.BlockSpec((1, out_pad), lambda i: (0, 0)),       # b2 (resident)
            ],
            out_specs=pl.BlockSpec((tile_b, out_pad), lambda i: (i, 0)),
        ),
        compiler_params=pltpu.CompilerParams(
            dimension_semantics=("parallel",),
            vmem_limit_bytes=32 << 20,   # actual use ~4 MiB double-buffered; keep headroom
        ),
        cost_estimate=pl.CostEstimate(
            flops=flops, transcendentals=0, bytes_accessed=bytes_accessed),
    )(x, w1_t, b1_2d, w2_t, b2_2d)

    return out[:B, :out_dim]


def init_params(key, input_size, hidden_size, output_size):
    """Deterministic init mimicking PyTorch nn.Linear default (uniform +/- 1/sqrt(fan_in))."""
    k1, k2, k3, k4 = jax.random.split(key, 4)
    bound1 = 1.0 / jnp.sqrt(input_size)
    bound2 = 1.0 / jnp.sqrt(hidden_size)
    w1 = jax.random.uniform(k1, (hidden_size, input_size), jnp.float32, -bound1, bound1)
    b1 = jax.random.uniform(k2, (hidden_size,), jnp.float32, -bound1, bound1)
    w2 = jax.random.uniform(k3, (output_size, hidden_size), jnp.float32, -bound2, bound2)
    b2 = jax.random.uniform(k4, (output_size,), jnp.float32, -bound2, bound2)
    return w1, b1, w2, b2


if __name__ == "__main__":
    input_size, hidden_size, output_size = 784, 128, 10
    batch = 8

    key = jax.random.PRNGKey(0)
    kx, kp = jax.random.split(key)
    x = jax.random.normal(kx, (batch, input_size), jnp.float32)
    w1, b1, w2, b2 = init_params(kp, input_size, hidden_size, output_size)

    # One-time weight layout prep (outside the forward hot path).
    w1_t, b1_2d, w2_t, b2_2d, out_dim = prepare_params(w1, b1, w2, b2)

    out = neural_net_forward(x, w1_t, b1_2d, w2_t, b2_2d, out_dim)
    out = jax.block_until_ready(out)

    # Pure-JAX f32 reference (same math as the PyTorch module). bf16 operands ->
    # looser tolerance; accumulation stays f32.
    ref = jnp.maximum(x @ w1.T + b1, 0.0) @ w2.T + b2
    assert out.shape == (batch, output_size)
    assert jnp.allclose(out, ref, atol=2e-2, rtol=2e-2), float(jnp.max(jnp.abs(out - ref)))

    print("KERNEL_OK")
</pallas_src>

<mosaic_0001>
module attributes {stable_mosaic.version = 11 : i64} {
  func.func @mlp_kernel(%arg0: i32, %arg1: memref<16x784xf32, #tpu.memory_space<vmem>>, %arg2: memref<784x128xbf16, #tpu.memory_space<vmem>>, %arg3: memref<1x128xf32, #tpu.memory_space<vmem>>, %arg4: memref<128x128xbf16, #tpu.memory_space<vmem>>, %arg5: memref<1x128xf32, #tpu.memory_space<vmem>>, %arg6: memref<16x128xf32, #tpu.memory_space<vmem>>) attributes {dimension_semantics = [#tpu.dimension_semantics<parallel>], iteration_bounds = array<i64: 1>, scalar_prefetch = 0 : i64, scratch_operands = 0 : i64, tpu.core_type = #tpu.core_type<tc>, window_params = [{transform_indices = @transform_0, window_bounds = array<i64: 16, 784>}, {pipeline_mode = #tpu.pipeline_mode<synchronous>, transform_indices = @transform_1, window_bounds = array<i64: 784, 128>}, {pipeline_mode = #tpu.pipeline_mode<synchronous>, transform_indices = @transform_2, window_bounds = array<i64: 1, 128>}, {pipeline_mode = #tpu.pipeline_mode<synchronous>, transform_indices = @transform_3, window_bounds = array<i64: 128, 128>}, {pipeline_mode = #tpu.pipeline_mode<synchronous>, transform_indices = @transform_4, window_bounds = array<i64: 1, 128>}, {transform_indices = @transform_5, window_bounds = array<i64: 16, 128>}]} {
    %c0 = arith.constant 0 : index
    %c0_0 = arith.constant 0 : index
    %0 = vector.load %arg1[%c0, %c0_0] : memref<16x784xf32, #tpu.memory_space<vmem>>, vector<16x784xf32>
    %1 = arith.truncf %0 : vector<16x784xf32> to vector<16x784xbf16>
    %c0_1 = arith.constant 0 : index
    %c0_2 = arith.constant 0 : index
    %2 = vector.load %arg2[%c0_1, %c0_2] : memref<784x128xbf16, #tpu.memory_space<vmem>>, vector<784x128xbf16>
    %cst = arith.constant dense<0.000000e+00> : vector<16x128xf32>
    %3 = tpu.matmul %1, %2, %cst {dimension_numbers = #tpu.dot_dimension_numbers<[1], [0], [0], [1], [0, 0, 1, 1], [], []>} : vector<16x784xbf16>, vector<784x128xbf16>, vector<16x128xf32> -> vector<16x128xf32>
    %c0_3 = arith.constant 0 : index
    %c0_4 = arith.constant 0 : index
    %4 = vector.load %arg3[%c0_3, %c0_4] : memref<1x128xf32, #tpu.memory_space<vmem>>, vector<1x128xf32>
    %5 = vector.broadcast %4 : vector<1x128xf32> to vector<16x128xf32>
    %6 = arith.addf %3, %5 : vector<16x128xf32>
    %cst_5 = arith.constant 0.000000e+00 : f32
    %7 = vector.broadcast %cst_5 : f32 to vector<16x128xf32>
    %8 = arith.maximumf %6, %7 : vector<16x128xf32>
    %9 = arith.truncf %8 : vector<16x128xf32> to vector<16x128xbf16>
    %c0_6 = arith.constant 0 : index
    %c0_7 = arith.constant 0 : index
    %10 = vector.load %arg4[%c0_6, %c0_7] : memref<128x128xbf16, #tpu.memory_space<vmem>>, vector<128x128xbf16>
    %cst_8 = arith.constant dense<0.000000e+00> : vector<16x128xf32>
    %11 = tpu.matmul %9, %10, %cst_8 {dimension_numbers = #tpu.dot_dimension_numbers<[1], [0], [0], [1], [0, 0, 1, 1], [], []>} : vector<16x128xbf16>, vector<128x128xbf16>, vector<16x128xf32> -> vector<16x128xf32>
    %c0_9 = arith.constant 0 : index
    %c0_10 = arith.constant 0 : index
    %12 = vector.load %arg5[%c0_9, %c0_10] : memref<1x128xf32, #tpu.memory_space<vmem>>, vector<1x128xf32>
    %13 = vector.broadcast %12 : vector<1x128xf32> to vector<16x128xf32>
    %14 = arith.addf %11, %13 : vector<16x128xf32>
    %c0_11 = arith.constant 0 : index
    %c0_12 = arith.constant 0 : index
    %15 = vector.load %arg6[%c0_11, %c0_12] : memref<16x128xf32, #tpu.memory_space<vmem>>, vector<16x128xf32>
    tpu.vector_store %arg6[%c0_11, %c0_12], %14 {strides = array<i32>} : memref<16x128xf32, #tpu.memory_space<vmem>>, vector<16x128xf32>,
    return
  }
  func.func @transform_0(%arg0: i32) -> (i32, i32) {
    %c0_i32 = arith.constant 0 : i32
    %c0_i32_0 = arith.constant 0 : i32
    return %arg0, %c0_i32 : i32, i32
  }
  func.func @transform_1(%arg0: i32) -> (i32, i32) {
    %c0_i32 = arith.constant 0 : i32
    %c0_i32_0 = arith.constant 0 : i32
    %c0_i32_1 = arith.constant 0 : i32
    return %c0_i32, %c0_i32_0 : i32, i32
  }
  func.func @transform_2(%arg0: i32) -> (i32, i32) {
    %c0_i32 = arith.constant 0 : i32
    %c0_i32_0 = arith.constant 0 : i32
    %c0_i32_1 = arith.constant 0 : i32
    return %c0_i32, %c0_i32_0 : i32, i32
  }
  func.func @transform_3(%arg0: i32) -> (i32, i32) {
    %c0_i32 = arith.constant 0 : i32
    %c0_i32_0 = arith.constant 0 : i32
    %c0_i32_1 = arith.constant 0 : i32
    return %c0_i32, %c0_i32_0 : i32, i32
  }
  func.func @transform_4(%arg0: i32) -> (i32, i32) {
    %c0_i32 = arith.constant 0 : i32
    %c0_i32_0 = arith.constant 0 : i32
    %c0_i32_1 = arith.constant 0 : i32
    return %c0_i32, %c0_i32_0 : i32, i32
  }
  func.func @transform_5(%arg0: i32) -> (i32, i32) {
    %c0_i32 = arith.constant 0 : i32
    %c0_i32_0 = arith.constant 0 : i32
    return %arg0, %c0_i32 : i32, i32
  }
}

</mosaic_0001>

<bundles_post_ra>
// kernel: neural_net_forward.1
= control target key start
LH: loop header
LB: loop body
LE: loop exit
PB: predicated region body
PF: predicated region fallthrough
CT: control target
= control target key end

     0   :  { %10 = vsyncpa [#allocation3], 0  ;;  %s994_s18 = smov [#allocation2]   ;;  %s1132_s0 = inlined_call_operand.vmem [shape: f32[16,784], index: 0, kind: input, shape index: {}]   ;;  %s1133_s1 = inlined_call_operand.hbm [shape: bf16[784,128], index: 1, kind: input, shape index: {}]   ;;  %s1134_s2 = inlined_call_operand.vmem [shape: f32[1,128], index: 2, kind: input, shape index: {}]   ;;  %s1135_s3 = inlined_call_operand.vmem [shape: bf16[128,128], index: 3, kind: input, shape index: {}]   ;;  %s1136_s4 = inlined_call_operand.vmem [shape: f32[1,128], index: 4, kind: input, shape index: {}]   ;;  %s1137_s5 = inlined_call_operand.vmem [shape: f32[16,128], index: 5, kind: output, shape index: {}]  }
   0x1   :  { %s18_s19 = sshll.u32 %s994_s18, 4  ;;  %s970_s22 = scalar_lea.hbm %s1133_s1, 6272  ;;  %s19_s19 = int_to_ptr.vmem [resolvable:$true] %s18_s19 }
   0x2   :  { %p971_p0 = scmp.ne.s32.totalorder %s1133_s1, %s970_s22  ;;  %p974_p1 = scmp.lt.u32.totalorder %s970_s22, %s1133_s1 }
   0x4   :  { %p976_p2 = pnand %p974_p1, %p971_p0 }
   0x6   :  { %979 = shalt.err (!%p976_p2)
}
   0x7   :  { %s980_s27 = scalar_lea.vmem %s19_s19, 6272  ;;  %p985_p4 = scmp.lt.s32.totalorder %s19_s19, %s19_s19 }
   0x8   :  { %p981_p3 = scmp.ne.s32.totalorder %s19_s19, %s980_s27  ;;  %p986_p5 = scmp.lt.s32.totalorder %s980_s27, %s980_s27 }
   0xa   :  { %p987_p6 = por %p986_p5, %p985_p4 }
   0xc   :  { %p988_p7 = pnand %p987_p6, %p981_p3 }
   0xe   :  { %991 = shalt.err (!%p988_p7)
}
   0xf   :  { %s995_s28 = smov 64   ;;  %s996_s29 = smov 4  }
  0x10   :  { %24 = dma.hbm_to_vmem [thread:$0]  %s1133_s1, 6272, %s19_s19, [#allocation3], %s995_s28, %s995_s28, %s996_s29  }
  0x11   :  { %992 = dma.done.wait [#allocation3], 6272  }
  0x12   :  { %993 = vsyncadd [#allocation3], 4294961024  ;;  %v913_v0 = vld [vmem:[#allocation2 + $0x40] sm:$0xff]   ;;  %v917_v4 = vld [vmem:[#allocation2 + $0x48] sm:$0xff]   ;;  %v997_v43 = vmov 0.0   ;;  %vm998_vm0 = vmmov 0  }
  0x13   :  { %v914_v1 = vld [vmem:[#allocation2] sm:$0xff]   ;;  %805 = vmatprep.subr.bf16.mxu0 %v913_v0  ;;  %v918_v5 = vld [vmem:[#allocation2 + $0x8] sm:$0xff]   ;;  %v921_v8 = vld [vmem:[#allocation2 + $0x50] sm:$0xff]   ;;  %vm455_vm1 = vcmask 130048  }
  0x14   :  { %v915_v2 = vld [vmem:[#allocation2 + $0xc0] sm:$0xff]   ;;  %806 = vmatpush3.bf16.msra.mxu0 %v914_v1  ;;  %v919_v6 = vld [vmem:[#allocation2 + $0xc8] sm:$0xff]   ;;  %v922_v9 = vld [vmem:[#allocation2 + $0x10] sm:$0xff]  }
  0x15   :  { %v916_v3 = vld [vmem:[#allocation2 + $0x80] sm:$0xff]   ;;  %827 = vmatprep.subr.bf16.mxu1 %v915_v2  ;;  %807 = vmatprep.subr.bf16.mxu0 %v917_v4  ;;  %v920_v7 = vld [vmem:[#allocation2 + $0x88] sm:$0xff]   ;;  %v923_v10 = vld [vmem:[#allocation2 + $0xd0] sm:$0xff]  }
  0x16   :  { %828 = vmatpush3.bf16.msra.mxu1 %v916_v3  ;;  %v924_v11 = vld [vmem:[#allocation2 + $0x90] sm:$0xff]   ;;  %v925_v12 = vld [vmem:[#allocation2 + $0x58] sm:$0xff]   ;;  %v929_v16 = vld [vmem:[#allocation2 + $0x60] sm:$0xff]  }
  0x17   :  { %829 = vmatprep.subr.bf16.mxu1 %v919_v6  ;;  %v926_v13 = vld [vmem:[#allocation2 + $0x18] sm:$0xff]   ;;  %v930_v17 = vld [vmem:[#allocation2 + $0x20] sm:$0xff]   ;;  %v933_v20 = vld [vmem:[#allocation2 + $0x68] sm:$0xff]  }
  0x18   :  { %808 = vmatpush3.bf16.msra.mxu0 %v918_v5  ;;  %v927_v14 = vld [vmem:[#allocation2 + $0xd8] sm:$0xff]   ;;  %v931_v18 = vld [vmem:[#allocation2 + $0xe0] sm:$0xff]   ;;  %v934_v21 = vld [vmem:[#allocation2 + $0x28] sm:$0xff]  }
  0x19   :  { %809 = vmatprep.subr.bf16.mxu0 %v921_v8  ;;  %v928_v15 = vld [vmem:[#allocation2 + $0x98] sm:$0xff]   ;;  %v932_v19 = vld [vmem:[#allocation2 + $0xa0] sm:$0xff]   ;;  %v935_v22 = vld [vmem:[#allocation2 + $0xe8] sm:$0xff]  }
  0x1a   :  { %830 = vmatpush3.bf16.msra.mxu1 %v920_v7  ;;  %v936_v23 = vld [vmem:[#allocation2 + $0xa8] sm:$0xff]   ;;  %v937_v24 = vld [vmem:[#allocation2 + $0x70] sm:$0xff]   ;;  %v941_v28 = vld [vmem:[#allocation2 + $0x78] sm:$0xff]  }
  0x1b   :  { %831 = vmatprep.subr.bf16.mxu1 %v923_v10  ;;  %v938_v25 = vld [vmem:[#allocation2 + $0x30] sm:$0xff]   ;;  %v942_v29 = vld [vmem:[#allocation2 + $0x38] sm:$0xff]   ;;  %v36_v31 = vld [vmem:[%s1132_s0 + $0x8] sm:$0xff] }
  0x1c   :  { %810 = vmatpush3.bf16.msra.mxu0 %v922_v9  ;;  %v939_v26 = vld [vmem:[#allocation2 + $0xf0] sm:$0xff]   ;;  %v943_v30 = vld [vmem:[#allocation2 + $0xf8] sm:$0xff]   ;;  %v43_v32 = vld [vmem:[%s1132_s0 + $0x40] sm:$0xff] }
  0x1d   :  { %811 = vmatprep.subr.bf16.mxu0 %v925_v12  ;;  %v940_v27 = vld [vmem:[#allocation2 + $0xb0] sm:$0xff]   ;;  %v50_v33 = vpack.c.bf16 %v43_v32, %v36_v31  ;;  %v944_v34 = vld [vmem:[#allocation2 + $0xb8] sm:$0xff]   ;;  %v35_v35 = vld [vmem:[%s1132_s0] sm:$0xff] }
  0x1e   :  { %832 = vmatpush3.bf16.msra.mxu1 %v924_v11  ;;  %v42_v36 = vld [vmem:[%s1132_s0 + $0x38] sm:$0xff]  ;;  %v945_v38 = vld [vmem:[#allocation2 + $0x140] sm:$0xff]   ;;  %v45_v40 = vld [vmem:[%s1132_s0 + $0x50] sm:$0xff] }
  0x1f   :  { %833 = vmatprep.subr.bf16.mxu1 %v927_v14  ;;  %491 = vmatprep.mubr.bf16.mxu0 %v50_v33  ;;  %v49_v37 = vpack.c.bf16 %v42_v36, %v35_v35  ;;  %v38_v39 = vld [vmem:[%s1132_s0 + $0x18] sm:$0xff]  ;;  %v946_v42 = vld [vmem:[#allocation2 + $0x100] sm:$0xff]   ;;  %v37_v44 = vld [vmem:[%s1132_s0 + $0x10] sm:$0xff] }
  0x20   :  { %812 = vmatpush3.bf16.msra.mxu0 %v926_v13  ;;  %v52_v41 = vpack.c.bf16 %v45_v40, %v38_v39  ;;  %v44_v45 = vld [vmem:[%s1132_s0 + $0x48] sm:$0xff]  ;;  %v949_v49 = vld [vmem:[#allocation2 + $0x150] sm:$0xff]   ;;  %v951_v51 = vld [vmem:[#allocation2 + $0x158] sm:$0xff]  }
  0x21   :  { %813 = vmatprep.subr.bf16.mxu0 %v929_v16  ;;  %v51_v46 = vpack.c.bf16 %v44_v45, %v37_v44  ;;  %v947_v47 = vld [vmem:[#allocation2 + $0x148] sm:$0xff]   ;;  %v950_v50 = vld [vmem:[#allocation2 + $0x110] sm:$0xff]   ;;  %v952_v52 = vld [vmem:[#allocation2 + $0x118] sm:$0xff]  }
  0x22   :  { %834 = vmatpush3.bf16.msra.mxu1 %v928_v15  ;;  %532 = vmatprep.mubr.bf16.mxu1 %v52_v41  ;;  %v948_v48 = vld [vmem:[#allocation2 + $0x108] sm:$0xff]   ;;  %v953_v53 = vld [vmem:[#allocation2 + $0x160] sm:$0xff]   ;;  %v957_v59 = vld [vmem:[#allocation2 + $0x170] sm:$0xff]  }
  0x23   :  { %835 = vmatprep.subr.bf16.mxu1 %v931_v18  ;;  %v954_v54 = vld [vmem:[#allocation2 + $0x120] sm:$0xff]   ;;  %v955_v55 = vld [vmem:[#allocation2 + $0x168] sm:$0xff]   ;;  %v41_v62 = vld [vmem:[%s1132_s0 + $0x30] sm:$0xff] }
  0x24   :  { %814 = vmatpush3.bf16.msra.mxu0 %v930_v17  ;;  %v961_v56 = vld [vmem:[#allocation2 + $0x180] sm:$0xff]   ;;  %v40_v57 = vld [vmem:[%s1132_s0 + $0x28] sm:$0xff]  ;;  %v958_v1 = vld [vmem:[#allocation2 + $0x130] sm:$0xff]  }
  0x25   :  { %815 = vmatprep.subr.bf16.mxu0 %v933_v20  ;;  %v956_v58 = vld [vmem:[#allocation2 + $0x128] sm:$0xff]   ;;  %v47_v60 = vld [vmem:[%s1132_s0 + $0x60] sm:$0xff]  ;;  %v959_v2 = vld [vmem:[#allocation2 + $0x178] sm:$0xff]  }
  0x26   :  { %836 = vmatpush3.bf16.msra.mxu1 %v932_v19  ;;  %v54_v61 = vpack.c.bf16 %v47_v60, %v40_v57  ;;  %v48_v63 = vld [vmem:[%s1132_s0 + $0x68] sm:$0xff]  ;;  %v960_v3 = vld [vmem:[#allocation2 + $0x138] sm:$0xff]   ;;  %v39_v4 = vld [vmem:[%s1132_s0 + $0x20] sm:$0xff] }
  0x27   :  { %837 = vmatprep.subr.bf16.mxu1 %v935_v22  ;;  %v55_v0 = vpack.c.bf16 %v48_v63, %v41_v62  ;;  %v46_v5 = vld [vmem:[%s1132_s0 + $0x58] sm:$0xff]  ;;  %v962_v7 = vld [vmem:[%s1135_s3] sm:$0xff]   ;;  %v963_v8 = vld [vmem:[%s1135_s3 + $0x8] sm:$0xff]  }
  0x28   :  { %816 = vmatpush3.bf16.msra.mxu0 %v934_v21  ;;  %v53_v6 = vpack.c.bf16 %v46_v5, %v39_v4  ;;  %v964_v9 = vld [vmem:[%s1135_s3 + $0x10] sm:$0xff]   ;;  %v965_v10 = vld [vmem:[%s1135_s3 + $0x18] sm:$0xff]   ;;  %v966_v11 = vld [vmem:[%s1135_s3 + $0x20] sm:$0xff]  }
  0x29   :  { %817 = vmatprep.subr.bf16.mxu0 %v937_v24  ;;  %v967_v12 = vld [vmem:[%s1135_s3 + $0x28] sm:$0xff]   ;;  %v968_v13 = vld [vmem:[%s1135_s3 + $0x30] sm:$0xff]   ;;  %v969_v14 = vld [vmem:[%s1135_s3 + $0x38] sm:$0xff]  }
  0x2a   :  { %838 = vmatpush3.bf16.msra.mxu1 %v936_v23  ;;  %v745_v16 = vld [vmem:[%s1134_s2] ss:$0 sm:$0xff] }
  0x2b   :  { %839 = vmatprep.subr.bf16.mxu1 %v939_v26 }
  0x2c   :  { %818 = vmatpush3.bf16.msra.mxu0 %v938_v25 }
  0x2d   :  { %819 = vmatprep.subr.bf16.mxu0 %v941_v28 }
  0x2e   :  { %840 = vmatpush3.bf16.msra.mxu1 %v940_v27 }
  0x2f   :  { %841 = vmatprep.subr.bf16.mxu1 %v943_v30 }
  0x30   :  { %820 = vmatpush3.bf16.msra.mxu0 %v942_v29 }
  0x31   :  { %849 = vmatprep.subr.bf16.mxu0 %v945_v38 }
  0x32   :  { %842 = vmatpush3.bf16.msra.mxu1 %v944_v34 }
  0x33   :  { %882 = vmatprep.subr.bf16.mxu1 %v997_v43  ;;  %492 = vmatmul.mubr.bf16.vlgmr.msra.gmra.mrb[0].mxu0 %v49_v37 }
  0x34   :  { %850 = vmatpush3.bf16.msra.mxu0 %v946_v42  ;;  %573 = vmatprep.mubr.bf16.mxu0 %v54_v61 }
  0x35   :  { %533 = vmatmul.mubr.bf16.vlgmr.msra.gmra.mrb[0].mxu1 %v51_v46  ;;  %851 = vmatprep.subr.bf16.mxu0 %v947_v47 }
  0x36   :  { %884 = vmatprep.mubr.msk.bf16.mxu1 %vm998_vm0, %v997_v43  ;;  %883 = vmatpush3.bf16.msra.mxu1 %v961_v56 }
  0x37   :  { %888 = vmatprep.subr.bf16.mxu1 %v997_v43 }
  0x38   :  { %852 = vmatpush3.bf16.msra.mxu0 %v948_v48 }
  0x39   :  { %853 = vmatprep.subr.bf16.mxu0 %v949_v49  ;;  %v796_v49 = vld [vmem:[%s1136_s4] ss:$0 sm:$0xff] }
  0x3c   :  { %854 = vmatpush3.bf16.msra.mxu0 %v950_v50 }
  0x3d   :  { %855 = vmatprep.subr.bf16.mxu0 %v951_v51  ;;  %885 = vmatmul.mubr.msk.bf16.vlgmr.msra.gmra.mrb[4].mxu1 %vm455_vm1, %v55_v0 }
  0x3e   :  { %904 = vmatprep.mubr.msk.bf16.mxu1 %vm998_vm0, %v997_v43  ;;  %889 = vmatpush3.bf16.msra.mxu1 %v962_v7 }
  0x3f   :  { %890 = vmatprep.subr.bf16.mxu1 %v997_v43 }
  0x40   :  { %856 = vmatpush3.bf16.msra.mxu0 %v952_v52 }
  0x41   :  { %857 = vmatprep.subr.bf16.mxu0 %v953_v53 }
  0x42   :  { %891 = vmatpush3.bf16.msra.mxu1 %v963_v8 }
  0x43   :  { %892 = vmatprep.subr.bf16.mxu1 %v997_v43 }
  0x44   :  { %858 = vmatpush3.bf16.msra.mxu0 %v954_v54 }
  0x45   :  { %859 = vmatprep.subr.bf16.mxu0 %v955_v55 }
  0x46   :  { %893 = vmatpush3.bf16.msra.mxu1 %v964_v9 }
  0x47   :  { %894 = vmatprep.subr.bf16.mxu1 %v997_v43 }
  0x48   :  { %860 = vmatpush3.bf16.msra.mxu0 %v956_v58 }
  0x49   :  { %861 = vmatprep.subr.bf16.mxu0 %v957_v59 }
  0x4a   :  { %895 = vmatpush3.bf16.msra.mxu1 %v965_v10 }
  0x4b   :  { %896 = vmatprep.subr.bf16.mxu1 %v997_v43 }
  0x4c   :  { %862 = vmatpush3.bf16.msra.mxu0 %v958_v1 }
  0x4d   :  { %863 = vmatprep.subr.bf16.mxu0 %v959_v2 }
  0x4e   :  { %897 = vmatpush3.bf16.msra.mxu1 %v966_v11 }
  0x4f   :  { %898 = vmatprep.subr.bf16.mxu1 %v997_v43 }
  0x50   :  { %864 = vmatpush3.bf16.msra.mxu0 %v960_v3 }
  0x52   :  { %899 = vmatpush3.bf16.msra.mxu1 %v967_v12 }
  0x53   :  { %574 = vmatmul.mubr.bf16.vlgmr.msra.gmra.mrb[4].mxu0 %v53_v6  ;;  %900 = vmatprep.subr.bf16.mxu1 %v997_v43 }
  0x56   :  { %901 = vmatpush3.bf16.msra.mxu1 %v968_v13 }
  0x57   :  { %902 = vmatprep.subr.bf16.mxu1 %v997_v43 }
  0x5a   :  { %903 = vmatpush3.bf16.msra.mxu1 %v969_v14 }
 0x106   :  { %v821_v15 = vpop.f32.mrb[0].mxu0 }
 0x107   :  { %v822_v17 = vpop.f32.mrb[1].mxu0 }
 0x108   :  { %v823_v18 = vadd.f32 %v822_v17, %v821_v15  ;;  %v824_v19 = vpop.f32.mrb[2].mxu0  ;;  %v843_v20 = vpop.f32.mrb[0].mxu1 }
 0x109   :  { %v825_v21 = vpop.f32.mrb[3].mxu0  ;;  %v844_v24 = vpop.f32.mrb[1].mxu1 }
 0x10a   :  { %v494_v22 = vadd.f32 %v823_v18, %v745_v16  ;;  %v826_v23 = vadd.f32 %v825_v21, %v824_v19  ;;  %v845_v25 = vadd.f32 %v844_v24, %v843_v20  ;;  %v846_v26 = vpop.f32.mrb[2].mxu1 }
 0x10b   :  { %v847_v28 = vpop.f32.mrb[3].mxu1 }
 0x10c   :  { %v497_v27 = vadd.f32 %v826_v23, %v745_v16  ;;  %v535_v29 = vadd.f32 %v845_v25, %v494_v22  ;;  %v848_v30 = vadd.f32 %v847_v28, %v846_v26 }
 0x10e   :  { %v538_v31 = vadd.f32 %v848_v30, %v497_v27 }
 0x110   :  { %v616_v32 = vpop.f32.mrb[4].mxu1 }
 0x111   :  { %v886_v33 = vpop.f32.mrb[5].mxu1 }
 0x112   :  { %v619_v34 = vpop.f32.mrb[6].mxu1 }
 0x113   :  { %v887_v35 = vpop.f32.mrb[7].mxu1 }
 0x126   :  { %v865_v36 = vpop.f32.mrb[4].mxu0 }
 0x127   :  { %v866_v37 = vpop.f32.mrb[5].mxu0 }
 0x128   :  { %v867_v38 = vadd.f32 %v866_v37, %v865_v36  ;;  %v868_v39 = vpop.f32.mrb[6].mxu0 }
 0x129   :  { %v869_v40 = vpop.f32.mrb[7].mxu0 }
 0x12a   :  { %v576_v41 = vadd.f32 %v867_v38, %v535_v29  ;;  %v870_v42 = vadd.f32 %v869_v40, %v868_v39 }
 0x12c   :  { %v617_v43 = vadd.f32 %v616_v32, %v576_v41  ;;  %v579_v44 = vadd.f32 %v870_v42, %v538_v31 }
 0x12e   :  { %v620_v45 = vadd.f32 %v619_v34, %v579_v44  ;;  %v623_v46 = vmax.f32 %v617_v43, 0.0 }
 0x130   :  { %v624_v47 = vmax.f32 %v620_v45, 0.0 }
 0x132   :  { %v625_v48 = vpack.c.bf16 %v624_v47, %v623_v46 }
 0x134   :  { %905 = vmatmul.mubr.bf16.vlgmr.msra.gmra.mrb[8].mxu1 %v625_v48 }
 0x207   :  { %v731_v50 = vpop.f32.mrb[8].mxu1 }
 0x208   :  { %v732_v51 = vadd.f32 %v796_v49, %v731_v50  ;;  %v906_v52 = vpop.f32.mrb[9].mxu1 }
 0x209   :  { %v734_v53 = vpop.f32.mrb[10].mxu1 }
 0x20a   :  { %738 = vst [vmem:[%s1137_s5] sm:$0xff] %v732_v51  ;;  %v735_v54 = vadd.f32 %v796_v49, %v734_v53  ;;  %v907_v55 = vpop.f32.mrb[11].mxu1 }
 0x20c   :  { %739 = vst [vmem:[%s1137_s5 + $0x8] sm:$0xff] %v735_v54 }
 0x20d   :  { %744 = vsyncpa [#allocation3], 1 }

</bundles_post_ra>
